<compile_context>
chip_gen: v6e
topology: v6e:2x2x1
jax: 0.10.0
libtpu: 0.0.40
codegen_flags: <defaults>
</compile_context>

<pallas_src>
import functools

import jax
import jax.numpy as jnp
from jax.experimental import pallas as pl
from jax.experimental.pallas import tpu as pltpu


def _activation(x, name):
    if name == "sigmoid":
        return jax.nn.sigmoid(x)
    if name == "relu":
        return jnp.maximum(x, 0.0)
    if name == "leakyrelu":
        # torch.nn.LeakyReLU default negative_slope = 0.01
        return jnp.where(x >= 0.0, x, 0.01 * x)
    if name == "tanh":
        return jnp.tanh(x)
    raise ValueError(f"unknown activation {name}")


def _head_store(h, wab_ref, bab_ref, out_ref):
    # Fused two-head projection in the batch-on-lanes layout: p is [2, tb]
    # (lane-dense).  abs() on row 0 only -> two dense row stores.
    p = jnp.dot(wab_ref[...], h, preferred_element_type=jnp.float32) + bab_ref[...]
    out_ref[0:1, :] = jnp.abs(p[0:1, :]).astype(out_ref.dtype)
    out_ref[1:2, :] = p[1:2, :].astype(out_ref.dtype)


def _kernel_d1(xT_ref, w1_ref, b1_ref, wab_ref, bab_ref, out_ref, *, activation):
    h = jnp.dot(w1_ref[...], xT_ref[...], preferred_element_type=jnp.float32)
    h = _activation(h + b1_ref[...], activation)
    _head_store(h, wab_ref, bab_ref, out_ref)


def _kernel_d3(xT_ref, w1_ref, b1_ref, w2_ref, b2_ref, w3_ref, b3_ref,
               wab_ref, bab_ref, out_ref, *, activation):
    h = jnp.dot(w1_ref[...], xT_ref[...], preferred_element_type=jnp.float32)
    h = _activation(h + b1_ref[...], activation)
    h = jnp.dot(w2_ref[...], h, preferred_element_type=jnp.float32)
    h = _activation(h + b2_ref[...], activation)
    h = jnp.dot(w3_ref[...], h, preferred_element_type=jnp.float32)
    h = _activation(h + b3_ref[...], activation)
    _head_store(h, wab_ref, bab_ref, out_ref)


def _resident_spec(arr):
    # Whole array kept VMEM-resident across all grid steps (constant index_map).
    return pl.BlockSpec(arr.shape, lambda i: (0,) * arr.ndim)


# Conservative scoped-VMEM budget (bytes).  Safe on v5e/v6e (128 MiB physical)
# and v7x (64 MiB per TensorCore) since we request it explicitly below.
_VMEM_BUDGET_BYTES = 32 * 1024 * 1024


def _derive_tb(B, num_users, weight_bytes, block_b):
    """Pick the batch-tile width from the VMEM budget instead of a fixed size."""
    # Per batch column: double-buffered x tile + double-buffered out tile, f32.
    per_col_bytes = 2 * (num_users + 2) * 4
    avail = max(_VMEM_BUDGET_BYTES - weight_bytes, per_col_bytes * 128)
    tb = min(block_b, avail // per_col_bytes)
    if B <= tb:
        return B
    # Multiple of 128 lanes for dense vector stores / aligned DMA rows.
    return max((tb // 128) * 128, 128)


def itemnet_forward(x, params, *, depth=1, activation="sigmoid", block_b=8192):
    """Pallas ItemNet forward. x: [B, num_users] float32 -> [B, 2] float32."""
    B, num_users = x.shape

    # Fused head weights: [2, head_in] and [2, 1].  (Tiny one-off concat; for a
    # hot loop, fuse once when building the params dict.)
    wab = jnp.concatenate([params["wa"], params["wb"]], axis=0)
    bab = jnp.concatenate([params["ba"], params["bb"]], axis=0)

    if depth == 1:
        weights = (params["w1"], params["b1"], wab, bab)
        kernel = functools.partial(_kernel_d1, activation=activation)
    elif depth == 3:
        weights = (params["w1"], params["b1"], params["w2"], params["b2"],
                   params["w3"], params["b3"], wab, bab)
        kernel = functools.partial(_kernel_d3, activation=activation)
    else:
        raise ValueError("depth must be 1 or 3")

    weight_bytes = sum(int(w.size) * w.dtype.itemsize for w in weights)
    tb = _derive_tb(B, num_users, weight_bytes, block_b)
    grid = (pl.cdiv(B, tb),)

    # Batch-on-lanes: stream x^T in [num_users, tb] blocks.
    xT = x.T

    in_specs = [pl.BlockSpec((num_users, tb), lambda i: (0, i))]
    in_specs += [_resident_spec(w) for w in weights]

    x_tile_bytes = num_users * tb * 4
    out_tile_bytes = 2 * tb * 4
    needed = weight_bytes + 2 * (x_tile_bytes + out_tile_bytes) + (4 << 20)
    vmem_limit = int(min(max(needed, 16 << 20), 48 << 20))

    outT = pl.pallas_call(
        kernel,
        out_shape=jax.ShapeDtypeStruct((2, B), jnp.float32),
        grid=grid,
        in_specs=in_specs,
        out_specs=pl.BlockSpec((2, tb), lambda i: (0, i)),
        compiler_params=pltpu.CompilerParams(
            dimension_semantics=("parallel",),
            vmem_limit_bytes=vmem_limit),
    )(xT, *weights)

    # Undo the lane-dense output layout with a tiny [2, B] transpose.
    return outT.T


def init_itemnet_params(key, num_users, depth=1):
    """PyTorch-Linear-style init, stored in kernel-friendly [out, in] layout."""
    fc1 = max(num_users // 2, 2)
    fc2 = max(num_users // 4, 2)
    fc3 = max(num_users // 8, 2)

    def linear(key, fan_in, fan_out):
        kw, kb = jax.random.split(key)
        bound = 1.0 / jnp.sqrt(float(fan_in))
        w = jax.random.uniform(kw, (fan_out, fan_in), jnp.float32, -bound, bound)
        b = jax.random.uniform(kb, (fan_out, 1), jnp.float32, -bound, bound)
        return w, b

    keys = jax.random.split(key, 5)
    p = {}
    p["w1"], p["b1"] = linear(keys[0], num_users, fc1)
    p["w2"], p["b2"] = linear(keys[1], fc1, fc2)
    p["w3"], p["b3"] = linear(keys[2], fc2, fc3)
    head_in = fc1 if depth == 1 else fc3
    p["wa"], p["ba"] = linear(keys[3], head_in, 1)
    p["wb"], p["bb"] = linear(keys[4], head_in, 1)
    return p


def itemnet_reference(x, params, *, depth=1, activation="sigmoid"):
    """Pure-JAX reference (standard [B, feat] layout) for correctness check."""
    h = _activation(x @ params["w1"].T + params["b1"].T, activation)
    if depth == 3:
        h = _activation(h @ params["w2"].T + params["b2"].T, activation)
        h = _activation(h @ params["w3"].T + params["b3"].T, activation)
    a = jnp.abs(h @ params["wa"].T + params["ba"].T)
    b = h @ params["wb"].T + params["bb"].T
    return jnp.concatenate([a, b], axis=1)


if __name__ == "__main__":
    key = jax.random.PRNGKey(0)
    k_x, k_p, k_x2 = jax.random.split(key, 3)

    num_users = 32          # fc1=16, fc2=8, fc3=4
    activation = "sigmoid"

    # Main correctness test (single batch tile).
    x = jax.random.normal(k_x, (8, num_users), dtype=jnp.float32)
    for depth in (1, 3):
        params = init_itemnet_params(k_p, num_users, depth=depth)
        out = jax.block_until_ready(
            itemnet_forward(x, params, depth=depth, activation=activation))
        ref = itemnet_reference(x, params, depth=depth, activation=activation)
        assert out.shape == (x.shape[0], 2), out.shape
        assert jnp.allclose(out, ref, atol=1e-5, rtol=1e-5), (depth, out, ref)

    # Multi-step grid with a partial last tile (B % tb != 0): verifies masked
    # writeback of the padded batch columns.
    xp = jax.random.normal(k_x2, (300, num_users), dtype=jnp.float32)
    params = init_itemnet_params(k_p, num_users, depth=3)
    outp = jax.block_until_ready(
        itemnet_forward(xp, params, depth=3, activation=activation, block_b=128))
    refp = itemnet_reference(xp, params, depth=3, activation=activation)
    assert outp.shape == (300, 2), outp.shape
    assert jnp.allclose(outp, refp, atol=1e-5, rtol=1e-5)

    print("KERNEL_OK")
</pallas_src>

<mosaic_0001>
module attributes {stable_mosaic.version = 11 : i64} {
  func.func @_kernel_d1(%arg0: i32, %arg1: memref<32x8xf32, #tpu.memory_space<vmem>>, %arg2: memref<16x32xf32, #tpu.memory_space<vmem>>, %arg3: memref<16x1xf32, #tpu.memory_space<vmem>>, %arg4: memref<2x16xf32, #tpu.memory_space<vmem>>, %arg5: memref<2x1xf32, #tpu.memory_space<vmem>>, %arg6: memref<2x8xf32, #tpu.memory_space<vmem>>) attributes {dimension_semantics = [#tpu.dimension_semantics<parallel>], iteration_bounds = array<i64: 1>, scalar_prefetch = 0 : i64, scratch_operands = 0 : i64, tpu.core_type = #tpu.core_type<tc>, window_params = [{transform_indices = @transform_0, window_bounds = array<i64: 32, 8>}, {pipeline_mode = #tpu.pipeline_mode<synchronous>, transform_indices = @transform_1, window_bounds = array<i64: 16, 32>}, {pipeline_mode = #tpu.pipeline_mode<synchronous>, transform_indices = @transform_2, window_bounds = array<i64: 16, 1>}, {pipeline_mode = #tpu.pipeline_mode<synchronous>, transform_indices = @transform_3, window_bounds = array<i64: 2, 16>}, {pipeline_mode = #tpu.pipeline_mode<synchronous>, transform_indices = @transform_4, window_bounds = array<i64: 2, 1>}, {transform_indices = @transform_5, window_bounds = array<i64: 2, 8>}]} {
    %c0 = arith.constant 0 : index
    %c0_0 = arith.constant 0 : index
    %0 = vector.load %arg2[%c0, %c0_0] : memref<16x32xf32, #tpu.memory_space<vmem>>, vector<16x32xf32>
    %c0_1 = arith.constant 0 : index
    %c0_2 = arith.constant 0 : index
    %1 = vector.load %arg1[%c0_1, %c0_2] : memref<32x8xf32, #tpu.memory_space<vmem>>, vector<32x8xf32>
    %cst = arith.constant dense<0.000000e+00> : vector<16x8xf32>
    %2 = tpu.matmul %0, %1, %cst {dimension_numbers = #tpu.dot_dimension_numbers<[1], [0], [0], [1], [0, 0, 1, 1], [], []>} : vector<16x32xf32>, vector<32x8xf32>, vector<16x8xf32> -> vector<16x8xf32>
    %c0_3 = arith.constant 0 : index
    %c0_4 = arith.constant 0 : index
    %3 = vector.load %arg3[%c0_3, %c0_4] : memref<16x1xf32, #tpu.memory_space<vmem>>, vector<16x1xf32>
    %4 = vector.broadcast %3 : vector<16x1xf32> to vector<16x8xf32>
    %5 = arith.addf %2, %4 : vector<16x8xf32>
    %6 = arith.negf %5 : vector<16x8xf32>
    %7 = math.exp %6 : vector<16x8xf32>
    %cst_5 = arith.constant 1.000000e+00 : f32
    %8 = vector.broadcast %cst_5 : f32 to vector<16x8xf32>
    %9 = arith.addf %8, %7 : vector<16x8xf32>
    %10 = arith.divf %8, %9 : vector<16x8xf32>
    %c0_6 = arith.constant 0 : index
    %c0_7 = arith.constant 0 : index
    %11 = vector.load %arg4[%c0_6, %c0_7] : memref<2x16xf32, #tpu.memory_space<vmem>>, vector<2x16xf32>
    %cst_8 = arith.constant dense<0.000000e+00> : vector<2x8xf32>
    %12 = tpu.matmul %11, %10, %cst_8 {dimension_numbers = #tpu.dot_dimension_numbers<[1], [0], [0], [1], [0, 0, 1, 1], [], []>} : vector<2x16xf32>, vector<16x8xf32>, vector<2x8xf32> -> vector<2x8xf32>
    %c0_9 = arith.constant 0 : index
    %c0_10 = arith.constant 0 : index
    %13 = vector.load %arg5[%c0_9, %c0_10] : memref<2x1xf32, #tpu.memory_space<vmem>>, vector<2x1xf32>
    %14 = vector.broadcast %13 : vector<2x1xf32> to vector<2x8xf32>
    %15 = arith.addf %12, %14 : vector<2x8xf32>
    %16 = vector.extract_strided_slice %15 {offsets = [0, 0], sizes = [1, 8], strides = [1, 1]} : vector<2x8xf32> to vector<1x8xf32>
    %17 = math.absf %16 : vector<1x8xf32>
    %c0_11 = arith.constant 0 : index
    %c0_12 = arith.constant 0 : index
    %18 = vector.load %arg6[%c0_11, %c0_12] : memref<2x8xf32, #tpu.memory_space<vmem>>, vector<1x8xf32>
    tpu.vector_store %arg6[%c0_11, %c0_12], %17 {strides = array<i32>} : memref<2x8xf32, #tpu.memory_space<vmem>>, vector<1x8xf32>,
    %19 = vector.extract_strided_slice %15 {offsets = [1, 0], sizes = [1, 8], strides = [1, 1]} : vector<2x8xf32> to vector<1x8xf32>
    %c1 = arith.constant 1 : index
    %c0_13 = arith.constant 0 : index
    %20 = vector.load %arg6[%c1, %c0_13] : memref<2x8xf32, #tpu.memory_space<vmem>>, vector<1x8xf32>
    tpu.vector_store %arg6[%c1, %c0_13], %19 {strides = array<i32>} : memref<2x8xf32, #tpu.memory_space<vmem>>, vector<1x8xf32>,
    return
  }
  func.func @transform_0(%arg0: i32) -> (i32, i32) {
    %c0_i32 = arith.constant 0 : i32
    %c0_i32_0 = arith.constant 0 : i32
    return %c0_i32, %arg0 : i32, i32
  }
  func.func @transform_1(%arg0: i32) -> (i32, i32) {
    %c0_i32 = arith.constant 0 : i32
    %c0_i32_0 = arith.constant 0 : i32
    %c0_i32_1 = arith.constant 0 : i32
    return %c0_i32, %c0_i32_0 : i32, i32
  }
  func.func @transform_2(%arg0: i32) -> (i32, i32) {
    %c0_i32 = arith.constant 0 : i32
    %c0_i32_0 = arith.constant 0 : i32
    %c0_i32_1 = arith.constant 0 : i32
    return %c0_i32, %c0_i32_0 : i32, i32
  }
  func.func @transform_3(%arg0: i32) -> (i32, i32) {
    %c0_i32 = arith.constant 0 : i32
    %c0_i32_0 = arith.constant 0 : i32
    %c0_i32_1 = arith.constant 0 : i32
    return %c0_i32, %c0_i32_0 : i32, i32
  }
  func.func @transform_4(%arg0: i32) -> (i32, i32) {
    %c0_i32 = arith.constant 0 : i32
    %c0_i32_0 = arith.constant 0 : i32
    %c0_i32_1 = arith.constant 0 : i32
    return %c0_i32, %c0_i32_0 : i32, i32
  }
  func.func @transform_5(%arg0: i32) -> (i32, i32) {
    %c0_i32 = arith.constant 0 : i32
    %c0_i32_0 = arith.constant 0 : i32
    return %c0_i32, %arg0 : i32, i32
  }
}

</mosaic_0001>

<bundles_post_ra>
// kernel: tpu_custom_call.1
= control target key start
LH: loop header
LB: loop body
LE: loop exit
PB: predicated region body
PF: predicated region fallthrough
CT: control target
= control target key end

     0   :  { %vm39_vm0 = vcmask 261120   ;;  %v301_v3 = vmov 0   ;;  %s370_s0 = inlined_call_operand.vmem [shape: f32[32,8], index: 0, kind: input, shape index: {}]   ;;  %s371_s1 = inlined_call_operand.vmem [shape: f32[16,32], index: 1, kind: input, shape index: {}]   ;;  %s372_s2 = inlined_call_operand.vmem [shape: f32[16,1], index: 2, kind: input, shape index: {}]   ;;  %s373_s3 = inlined_call_operand.vmem [shape: f32[2,16], index: 3, kind: input, shape index: {}]   ;;  %s374_s4 = inlined_call_operand.vmem [shape: f32[2,1], index: 4, kind: input, shape index: {}]   ;;  %s375_s5 = inlined_call_operand.hbm [shape: f32[2,8], index: 5, kind: output, shape index: {}]  }
   0x1   :  { %v26_v0 = vld [vmem:[%s370_s0 + $0x18] sm:$0xff]  ;;  %v25_v1 = vld [vmem:[%s370_s0 + $0x10] sm:$0xff]  ;;  %v21_v2 = vld [vmem:[%s371_s1] sm:$0xff]  ;;  %269 = vset.pattern.permute.xlu0 %v301_v3 }
   0x2   :  { %247 = vmatprep.subr.mxu0 %v26_v0  ;;  %v24_v4 = vld [vmem:[%s370_s0 + $0x8] sm:$0xff]  ;;  %255 = vmatprep.mubr.msk.f32.mxu0 %vm39_vm0, %v21_v2 }
   0x3   :  { %248 = vmatpush3.msra.mxu0 %v26_v0  ;;  %v28_v5 = vld [vmem:[%s372_s2 + $0x8] sm:$0xff] }
   0x4   :  { %10 = vsyncpa [#allocation3], 0  ;;  %249 = vmatprep.subr.mxu0 %v25_v1  ;;  %36 = vperm.xlu0 %269, %v28_v5   ;;  %v23_v6 = vld [vmem:[%s370_s0] sm:$0xff]  ;;  %v22_v8 = vld [vmem:[%s371_s1 + $0x8] sm:$0xff]  ;;  %v302_v9 = vmov 0.0   ;;  %vm303_vm1 = vmmov 0  }
   0x5   :  { %250 = vmatpush3.msra.mxu0 %v25_v1  ;;  %v27_v7 = vld [vmem:[%s372_s2] sm:$0xff]  ;;  %270 = vset.pattern.permute.xlu1 %v301_v3  ;;  %vm140_vm2 = vcmask 130048   ;;  %vm217_vm3 = vcmask 58369   ;;  %vm215_vm4 = vcmask 57344  }
   0x6   :  { %251 = vmatprep.subr.mxu0 %v24_v4  ;;  %258 = vmatprep.subr.mxu1 %v302_v9  ;;  %v134_v10 = vld [vmem:[%s374_s4] sm:$0x3]  ;;  %s304_s4 = smov [#allocation2]  }
   0x7   :  { %252 = vmatpush3.msra.mxu0 %v24_v4  ;;  %262 = vmatprep.mubr.msk.f32.mxu1 %vm303_vm1, %v302_v9  ;;  %v133_v24 = vld [vmem:[%s373_s3] sm:$0x3]  ;;  %s225_s10 = sshll.u32 %s304_s4, 4  ;;  %s226_s10 = int_to_ptr.vmem [resolvable:$true] %s225_s10 }
   0x8   :  { %253 = vmatprep.subr.mxu0 %v23_v6  ;;  %31 = vperm.xlu0 %269, %v27_v7   ;;  %s279_s11 = scalar_lea.vmem %s226_s10, 32  ;;  %p284_p1 = scmp.lt.s32.totalorder %s226_s10, %s226_s10 }
   0x9   :  { %254 = vmatpush3.msra.mxu0 %v23_v6  ;;  %137 = vperm.xlu1 %270, %v134_v10   ;;  %p280_p0 = scmp.ne.s32.totalorder %s226_s10, %s279_s11  ;;  %p285_p2 = scmp.lt.s32.totalorder %s279_s11, %s279_s11 }
   0xa   :  { %256 = vmatmul.mubr.msk.f32.vlgmr.msra.gmra.mxu0 %vm39_vm0, %v22_v8 }
   0xb   :  { %p286_p3 = por %p285_p2, %p284_p1 }
   0xd   :  { %p287_p4 = pnand %p286_p3, %p280_p0 }
  0x7f   :  { %v37_v11 = vpop.permute.xlu0 %36 }
  0x83   :  { %v32_v14 = vpop.permute.xlu0 %31 }
  0x84   :  { %v138_v26 = vpop.permute.xlu1 %137 }
  0xca   :  { %v257_v12 = vpop.f32.mrf.mxu0 }
  0xcb   :  { %v118_v13 = vadd.f32 %v257_v12, %v37_v11 }
  0xcc   :  { %v112_v15 = vpop.f32.mrf.mxu0 }
  0xcd   :  { %v236_v16 = vmul.f32 -1.442695, %v118_v13  ;;  %v113_v17 = vadd.f32 %v112_v15, %v32_v14 }
  0xcf   :  { %271 = vpow2.f32 %v236_v16  ;;  %v235_v18 = vmul.f32 -1.442695, %v113_v17 }
  0xd1   :  { %273 = vpow2.f32 %v235_v18 }
  0xdc   :  { %v272_v19 = vpop.eup %271 }
  0xdd   :  { %v128_v20 = vadd.f32 1.0, %v272_v19 }
  0xde   :  { %v274_v21 = vpop.eup %273 }
  0xdf   :  { %275 = vrcp.f32 %v128_v20  ;;  %v127_v22 = vadd.f32 1.0, %v274_v21 }
  0xe1   :  { %277 = vrcp.f32 %v127_v22 }
  0xec   :  { %v276_v23 = vpop.eup %275 }
  0xed   :  { %259 = vmatpush3.msra.mxu1 %v276_v23 }
  0xee   :  { %v278_v25 = vpop.eup %277  ;;  %260 = vmatprep.subr.mxu1 %v302_v9 }
  0xef   :  { %261 = vmatpush3.msra.mxu1 %v278_v25 }
  0xf0   :  { %263 = vmatmul.mubr.msk.f32.vlgmr.msra.gmra.mxu1 %vm140_vm2, %v133_v24 }
 0x1b0   :  { %v210_v27 = vpop.f32.mrf.mxu1 }
 0x1b1   :  { %v211_v28 = vadd.f32 %v210_v27, %v138_v26 }
 0x1b2   :  { %v264_v29 = vpop.f32.mrf.mxu1 }
 0x1b3   :  { %v214_v30 = vand.u32 2147483647, %v211_v28  ;;  %218 = vst.msk [vmem:[#allocation2] sm:$0x2] %vm217_vm3, %v211_v28 }
 0x1b5   :  { %216 = vst.msk [vmem:[#allocation2] sm:$0x1] %vm215_vm4, %v214_v30 }
 0x1b6   :  { %290 = shalt.err (!%p287_p4)
}
 0x1b7   :  { %228 = dma.vmem_to_hbm [thread:$0]  %s226_s10, 32, %s375_s5, [#allocation3]  }
 0x1b8   :  { %299 = dma.done.wait [#allocation3], 32  }
 0x1b9   :  { %300 = vsyncadd [#allocation3], 4294967264 }
 0x1ba   :  { %232 = vsyncpa [#allocation3], 1 }

</bundles_post_ra>
